<compile_context>
chip_gen: v7x
topology: tpu7x:2x2x1
jax: 0.10.0
libtpu: 0.0.40
codegen_flags: <defaults>
</compile_context>

<pallas_src>
import jax
import jax.numpy as jnp
from jax.experimental import pallas as pl
from jax.experimental.pallas import tpu as pltpu


def _mean_pool_kernel(h_ref, m_ref, inv_ref, o_ref):
    # h_ref   : (tb, ts, th)  hidden-state tile, native dtype
    # m_ref   : (tb, 1, ts)   mask tile (hidden dtype), lane-dense
    # inv_ref : (tb, 1, 1)    f32, 1 / clamp(sum(mask), 1e-9)
    # o_ref   : (tb, 1, th)   f32 output block, resident across the S grid axis
    s_idx = pl.program_id(2)

    @pl.when(s_idx == 0)
    def _():
        o_ref[...] = jnp.zeros_like(o_ref)

    # Masked partial sum over this sequence tile on the MXU:
    # (tb, 1, ts) x (tb, ts, th) -> (tb, 1, th), accumulated in f32.
    o_ref[...] += jnp.einsum(
        "bqs,bsh->bqh", m_ref[...], h_ref[...],
        preferred_element_type=jnp.float32)

    @pl.when(s_idx == pl.num_programs(2) - 1)
    def _():
        o_ref[...] *= inv_ref[...]


def _physical_vmem_bytes():
    try:
        kind = jax.devices()[0].device_kind.lower()
    except Exception:
        kind = ""
    if "v7" in kind:
        return 64 * 1024 * 1024
    return 128 * 1024 * 1024  # v4 / v5e / v5p / v6e


def mean_pooling(last_hidden_state, attention_mask, *, tb=None, th=None, ts=None):
    B, S, H = last_hidden_state.shape
    assert attention_mask.shape == (B, S)
    itemsize = jnp.dtype(last_hidden_state.dtype).itemsize

    phys_vmem = _physical_vmem_bytes()
    vmem_limit = (phys_vmem * 3) // 4        # 48 MiB on v7x, 96 MiB on v5e/v6e
    budget = vmem_limit // 4                 # per-buffer hidden-tile budget

    # --- batch tile -----------------------------------------------------------
    if tb is None:
        tb = 8 if (B >= 8 and B % 8 == 0) else B
    assert B % tb == 0, f"batch tile {tb} must divide B={B}"

    # --- hidden tile (lane axis) ----------------------------------------------
    if th is None:
        th = H
        # v7x megacore: if the batch axis has only one block, split H in two.
        if B // tb < 2 and H % 256 == 0:
            th = H // 2
    assert H % th == 0 and (th % 128 == 0 or th == H)

    # --- sequence tile (reduction axis) + optional zero-padding ----------------
    ts_cap = max(128, budget // max(1, tb * th * itemsize))
    if ts is None:
        if S <= ts_cap:
            ts, s_pad = S, S
        else:
            cap = max(128, ts_cap - ts_cap % 128)
            ts, s_pad = 0, S
            for cand in range(cap, 127, -128):
                if S % cand == 0:
                    ts = cand
                    break
            if ts == 0:
                # No multiple-of-128 tile divides S: pad S (zero mask rows are inert).
                ts = cap
                s_pad = pl.cdiv(S, ts) * ts
    else:
        assert ts == S or ts % 128 == 0, "ts must be a multiple of 128 or equal S"
        s_pad = pl.cdiv(S, ts) * ts
    assert s_pad % ts == 0

    # --- operands ---------------------------------------------------------------
    h_dtype = last_hidden_state.dtype
    mask_dtype = h_dtype if jnp.issubdtype(h_dtype, jnp.floating) else jnp.float32
    mask3 = attention_mask.astype(mask_dtype).reshape(B, 1, S)

    counts = jnp.sum(attention_mask.astype(jnp.float32), axis=1)        # (B,)
    inv = (1.0 / jnp.maximum(counts, 1e-9)).reshape(B, 1, 1)            # (B,1,1) f32

    hidden = last_hidden_state
    if s_pad != S:
        pad = s_pad - S
        hidden = jnp.pad(hidden, ((0, 0), (0, pad), (0, 0)))
        mask3 = jnp.pad(mask3, ((0, 0), (0, 0), (0, pad)))

    grid = (B // tb, H // th, s_pad // ts)

    out3 = pl.pallas_call(
        _mean_pool_kernel,
        out_shape=jax.ShapeDtypeStruct((B, 1, H), jnp.float32),
        grid_spec=pltpu.PrefetchScalarGridSpec(
            num_scalar_prefetch=0,
            grid=grid,
            in_specs=[
                # TODO(synk): add pipeline_mode=pl.Buffered(3) here when a very
                # large H forces ts down to <= 64 (deeper pipelining for the
                # resulting small per-step DMAs).
                pl.BlockSpec((tb, ts, th), lambda b, h, s: (b, s, h)),
                pl.BlockSpec((tb, 1, ts), lambda b, h, s: (b, 0, s)),
                pl.BlockSpec((tb, 1, 1), lambda b, h, s: (b, 0, 0)),
            ],
            out_specs=pl.BlockSpec((tb, 1, th), lambda b, h, s: (b, 0, h)),
        ),
        compiler_params=pltpu.CompilerParams(
            dimension_semantics=("parallel", "parallel", "arbitrary"),
            vmem_limit_bytes=vmem_limit,
        ),
    )(hidden, mask3, inv)

    return out3.reshape(B, H)


def mean_pooling_ref(last_hidden_state, attention_mask):
    m = attention_mask[:, :, None].astype(jnp.float32)
    s = jnp.sum(last_hidden_state.astype(jnp.float32) * m, axis=1)
    c = jnp.maximum(jnp.sum(m, axis=1), 1e-9)
    return s / c


if __name__ == "__main__":
    key = jax.random.PRNGKey(0)
    k1, k2, k3 = jax.random.split(key, 3)

    def check(h, m, **kw):
        out = jax.block_until_ready(mean_pooling(h, m, **kw))
        ref = mean_pooling_ref(h, m)
        assert out.shape == ref.shape
        err = jnp.max(jnp.abs(out - ref))
        assert jnp.allclose(out, ref, atol=1e-4, rtol=1e-4), f"mismatch, max abs err={err}"
        return out

    # 1) Small shape consistent with the module's forward (batch=2, seq=8, hidden=32).
    B, S, H = 2, 8, 32
    h1 = jax.random.normal(k1, (B, S, H), dtype=jnp.float32)
    lengths1 = jnp.array([S, S // 2])
    m1 = (jnp.arange(S)[None, :] < lengths1[:, None]).astype(jnp.int32)
    check(h1, m1)

    # 2) Tiled sequence reduction + zero-padded sequence (S=320 -> 384 with ts=128).
    B2, S2, H2 = 8, 320, 128
    h2 = jax.random.normal(k2, (B2, S2, H2), dtype=jnp.float32)
    lengths2 = (jnp.arange(B2) * 37) % S2 + 1
    m2 = (jnp.arange(S2)[None, :] < lengths2[:, None]).astype(jnp.int32)
    check(h2, m2, ts=128)

    # 3) Single batch block -> hidden axis split into two parallel blocks; bf16 input.
    B3, S3, H3 = 4, 256, 256
    h3 = jax.random.normal(k3, (B3, S3, H3), dtype=jnp.bfloat16)
    lengths3 = (jnp.arange(B3) * 61) % S3 + 1
    m3 = (jnp.arange(S3)[None, :] < lengths3[:, None]).astype(jnp.int32)
    check(h3, m3)

    print("KERNEL_OK")
</pallas_src>

<mosaic_0001>
module attributes {stable_mosaic.version = 11 : i64} {
  func.func @_mean_pool_kernel(%arg0: i32, %arg1: i32, %arg2: i32, %arg3: memref<2x8x32xf32, #tpu.memory_space<vmem>>, %arg4: memref<2x1x8xf32, #tpu.memory_space<vmem>>, %arg5: memref<2x1x1xf32, #tpu.memory_space<vmem>>, %arg6: memref<2x1x32xf32, #tpu.memory_space<vmem>>) attributes {dimension_semantics = [#tpu.dimension_semantics<parallel>, #tpu.dimension_semantics<parallel>, #tpu.dimension_semantics<arbitrary>], iteration_bounds = array<i64: 1, 1, 1>, scalar_prefetch = 0 : i64, scratch_operands = 0 : i64, tpu.core_type = #tpu.core_type<tc>, window_params = [{transform_indices = @transform_0, window_bounds = array<i64: 2, 8, 32>}, {transform_indices = @transform_1, window_bounds = array<i64: 2, 1, 8>}, {transform_indices = @transform_2, window_bounds = array<i64: 2, 1, 1>}, {transform_indices = @transform_3, window_bounds = array<i64: 2, 1, 32>}]} {
    %c0_i32 = arith.constant 0 : i32
    %0 = arith.cmpi eq, %arg2, %c0_i32 : i32
    %1 = arith.extui %0 : i1 to i32
    %c0_i32_0 = arith.constant 0 : i32
    %2 = arith.cmpi ne, %1, %c0_i32_0 : i32
    scf.if %2 {
      %cst_14 = arith.constant 0.000000e+00 : f32
      %12 = vector.broadcast %cst_14 : f32 to vector<2x1x32xf32>
      %c0_15 = arith.constant 0 : index
      %c0_16 = arith.constant 0 : index
      %c0_17 = arith.constant 0 : index
      %13 = vector.load %arg6[%c0_15, %c0_16, %c0_17] : memref<2x1x32xf32, #tpu.memory_space<vmem>>, vector<2x1x32xf32>
      tpu.vector_store %arg6[%c0_15, %c0_16, %c0_17], %12 {strides = array<i32>} : memref<2x1x32xf32, #tpu.memory_space<vmem>>, vector<2x1x32xf32>,
    } else {
    }
    %c0 = arith.constant 0 : index
    %c0_1 = arith.constant 0 : index
    %c0_2 = arith.constant 0 : index
    %3 = vector.load %arg6[%c0, %c0_1, %c0_2] : memref<2x1x32xf32, #tpu.memory_space<vmem>>, vector<2x1x32xf32>
    %c0_3 = arith.constant 0 : index
    %c0_4 = arith.constant 0 : index
    %c0_5 = arith.constant 0 : index
    %4 = vector.load %arg4[%c0_3, %c0_4, %c0_5] : memref<2x1x8xf32, #tpu.memory_space<vmem>>, vector<2x1x8xf32>
    %c0_6 = arith.constant 0 : index
    %c0_7 = arith.constant 0 : index
    %c0_8 = arith.constant 0 : index
    %5 = vector.load %arg3[%c0_6, %c0_7, %c0_8] : memref<2x8x32xf32, #tpu.memory_space<vmem>>, vector<2x8x32xf32>
    "tpu.trace_start"() <{level = 10 : i32, message = "bqs,bsh->bqh"}> : () -> ()
    %cst = arith.constant dense<0.000000e+00> : vector<2x1x32xf32>
    %6 = tpu.matmul %4, %5, %cst {dimension_numbers = #tpu.dot_dimension_numbers<[2], [1], [1], [2], [0, 0, 0, 1, 1, 2], [0], [0]>} : vector<2x1x8xf32>, vector<2x8x32xf32>, vector<2x1x32xf32> -> vector<2x1x32xf32>
    "tpu.trace_stop"() : () -> ()
    %7 = arith.addf %3, %6 : vector<2x1x32xf32>
    %c0_9 = arith.constant 0 : index
    %c0_10 = arith.constant 0 : index
    %c0_11 = arith.constant 0 : index
    %8 = vector.load %arg6[%c0_9, %c0_10, %c0_11] : memref<2x1x32xf32, #tpu.memory_space<vmem>>, vector<2x1x32xf32>
    tpu.vector_store %arg6[%c0_9, %c0_10, %c0_11], %7 {strides = array<i32>} : memref<2x1x32xf32, #tpu.memory_space<vmem>>, vector<2x1x32xf32>,
    %c0_i32_12 = arith.constant 0 : i32
    %9 = arith.cmpi eq, %arg2, %c0_i32_12 : i32
    %10 = arith.extui %9 : i1 to i32
    %c0_i32_13 = arith.constant 0 : i32
    %11 = arith.cmpi ne, %10, %c0_i32_13 : i32
    scf.if %11 {
      %c0_14 = arith.constant 0 : index
      %c0_15 = arith.constant 0 : index
      %c0_16 = arith.constant 0 : index
      %12 = vector.load %arg6[%c0_14, %c0_15, %c0_16] : memref<2x1x32xf32, #tpu.memory_space<vmem>>, vector<2x1x32xf32>
      %c0_17 = arith.constant 0 : index
      %c0_18 = arith.constant 0 : index
      %c0_19 = arith.constant 0 : index
      %13 = vector.load %arg5[%c0_17, %c0_18, %c0_19] : memref<2x1x1xf32, #tpu.memory_space<vmem>>, vector<2x1x1xf32>
      %14 = vector.broadcast %13 : vector<2x1x1xf32> to vector<2x1x32xf32>
      %15 = arith.mulf %12, %14 : vector<2x1x32xf32>
      %c0_20 = arith.constant 0 : index
      %c0_21 = arith.constant 0 : index
      %c0_22 = arith.constant 0 : index
      %16 = vector.load %arg6[%c0_20, %c0_21, %c0_22] : memref<2x1x32xf32, #tpu.memory_space<vmem>>, vector<2x1x32xf32>
      tpu.vector_store %arg6[%c0_20, %c0_21, %c0_22], %15 {strides = array<i32>} : memref<2x1x32xf32, #tpu.memory_space<vmem>>, vector<2x1x32xf32>,
    } else {
    }
    return
  }
  func.func @transform_0(%arg0: i32, %arg1: i32, %arg2: i32) -> (i32, i32, i32) {
    %c0_i32 = arith.constant 0 : i32
    return %arg0, %arg2, %arg1 : i32, i32, i32
  }
  func.func @transform_1(%arg0: i32, %arg1: i32, %arg2: i32) -> (i32, i32, i32) {
    %c0_i32 = arith.constant 0 : i32
    %c0_i32_0 = arith.constant 0 : i32
    return %arg0, %c0_i32, %arg2 : i32, i32, i32
  }
  func.func @transform_2(%arg0: i32, %arg1: i32, %arg2: i32) -> (i32, i32, i32) {
    %c0_i32 = arith.constant 0 : i32
    %c0_i32_0 = arith.constant 0 : i32
    %c0_i32_1 = arith.constant 0 : i32
    return %arg0, %c0_i32, %c0_i32_0 : i32, i32, i32
  }
  func.func @transform_3(%arg0: i32, %arg1: i32, %arg2: i32) -> (i32, i32, i32) {
    %c0_i32 = arith.constant 0 : i32
    %c0_i32_0 = arith.constant 0 : i32
    return %arg0, %c0_i32, %arg1 : i32, i32, i32
  }
}

</mosaic_0001>

<bundles_post_ra>
// kernel: tpu_custom_call.1
= control target key start
LH: loop header
LB: loop body
LE: loop exit
PB: predicated region body
PF: predicated region fallthrough
CT: control target
= control target key end

     0   :  { %8 = vsyncpa [#allocation3], 0  ;;  %s484_s0 = inlined_call_operand.hbm [shape: f32[2,8,32], index: 0, kind: input, shape index: {}]   ;;  %s485_s1 = inlined_call_operand.hbm [shape: f32[2,1,8], index: 1, kind: input, shape index: {}]   ;;  %s486_s2 = inlined_call_operand.hbm [shape: f32[2,1,1], index: 2, kind: input, shape index: {}]   ;;  %s487_s3 = inlined_call_operand.hbm [shape: f32[2,1,32], index: 3, kind: output, shape index: {}]  }
   0x1   :  { %9 = vsyncpa [#allocation6], 0 }
   0x2   :  { %10 = vsyncpa [#allocation4], 0  ;;  %s390_s12 = smov [#allocation5]   ;;  %s296_s16 = scalar_lea.hbm %s485_s1, 32 }
   0x3   :  { %s28_s13 = sshll.u32 %s390_s12, 4  ;;  %p297_p0 = scmp.ne.s32.totalorder %s485_s1, %s296_s16  ;;  %s29_s13 = int_to_ptr.vmem [resolvable:$true] %s28_s13 }
   0x4   :  { %p300_p1 = scmp.lt.u32.totalorder %s296_s16, %s485_s1 }
   0x6   :  { %p302_p2 = pnand %p300_p1, %p297_p0 }
   0x8   :  { %305 = shalt.err (!%p302_p2)
}
   0x9   :  { %s306_s21 = scalar_lea.vmem %s29_s13, 32  ;;  %p311_p4 = scmp.lt.s32.totalorder %s29_s13, %s29_s13 }
   0xa   :  { %p307_p3 = scmp.ne.s32.totalorder %s29_s13, %s306_s21  ;;  %p312_p5 = scmp.lt.s32.totalorder %s306_s21, %s306_s21 }
   0xc   :  { %p313_p6 = por %p312_p5, %p311_p4 }
   0xe   :  { %p314_p7 = pnand %p313_p6, %p307_p3 }
  0x10   :  { %317 = shalt.err (!%p314_p7)
}
  0x11   :  { %s391_s22 = smov 16   ;;  %s392_s23 = smov 1  }
  0x12   :  { %34 = dma.hbm_to_vmem [thread:$0]  %s485_s1, 32, %s29_s13, [#allocation6], %s391_s22, %s391_s22, %s392_s23  }
  0x13   :  { %s393_s26 = smov [#allocation2]   ;;  %s318_s30 = scalar_lea.hbm %s484_s0, 256 }
  0x14   :  { %s16_s27 = sshll.u32 %s393_s26, 4  ;;  %p319_p8 = scmp.ne.s32.totalorder %s484_s0, %s318_s30  ;;  %s17_s27 = int_to_ptr.vmem [resolvable:$true] %s16_s27 }
  0x15   :  { %p322_p9 = scmp.lt.u32.totalorder %s318_s30, %s484_s0 }
  0x17   :  { %p324_p10 = pnand %p322_p9, %p319_p8 }
  0x19   :  { %327 = shalt.err (!%p324_p10)
}
  0x1a   :  { %s328_s8 = scalar_lea.vmem %s17_s27, 256  ;;  %p333_p12 = scmp.lt.s32.totalorder %s17_s27, %s17_s27 }
  0x1b   :  { %p329_p11 = scmp.ne.s32.totalorder %s17_s27, %s328_s8  ;;  %p334_p13 = scmp.lt.s32.totalorder %s328_s8, %s328_s8 }
  0x1d   :  { %p335_p0 = por %p334_p13, %p333_p12 }
  0x1f   :  { %p336_p1 = pnand %p335_p0, %p329_p11 }
  0x21   :  { %339 = shalt.err (!%p336_p1)
}
  0x22   :  { %s394_s1 = smov 128   ;;  %s395_s9 = smov 8  }
  0x23   :  { %22 = dma.hbm_to_vmem [thread:$0]  %s484_s0, 256, %s17_s27, [#allocation3], %s394_s1, %s394_s1, %s395_s9  }
  0x24   :  { %s396_s12 = smov [#allocation7]   ;;  %s340_s16 = scalar_lea.hbm %s486_s2, 32 }
  0x25   :  { %s40_s13 = sshll.u32 %s396_s12, 4  ;;  %p341_p2 = scmp.ne.s32.totalorder %s486_s2, %s340_s16  ;;  %s41_s13 = int_to_ptr.vmem [resolvable:$true] %s40_s13 }
  0x26   :  { %p344_p3 = scmp.lt.u32.totalorder %s340_s16, %s486_s2 }
  0x28   :  { %p346_p4 = pnand %p344_p3, %p341_p2 }
  0x2a   :  { %349 = shalt.err (!%p346_p4)
}
  0x2b   :  { %s350_s21 = scalar_lea.vmem %s41_s13, 32  ;;  %p355_p6 = scmp.lt.s32.totalorder %s41_s13, %s41_s13 }
  0x2c   :  { %p351_p5 = scmp.ne.s32.totalorder %s41_s13, %s350_s21  ;;  %p356_p7 = scmp.lt.s32.totalorder %s350_s21, %s350_s21 }
  0x2e   :  { %p357_p8 = por %p356_p7, %p355_p6 }
  0x30   :  { %p358_p9 = pnand %p357_p8, %p351_p5 }
  0x32   :  { %361 = shalt.err (!%p358_p9)
}
  0x33   :  { %46 = dma.hbm_to_vmem [thread:$0]  %s486_s2, 32, %s41_s13, [#allocation6], %s391_s22, %s391_s22, %s392_s23  }
  0x34   :  { %384 = dma.done.wait [#allocation3], 256  }
  0x35   :  { %385 = vsyncadd [#allocation3], 4294967040 }
  0x36   :  { %386 = dma.done.wait [#allocation6], 64  }
  0x37   :  { %387 = vsyncadd [#allocation6], 4294967232  ;;  %v397_v0 = vmov 0.0   ;;  %vm398_vm0 = vmmov 0   ;;  %v399_v1 = vmov 0   ;;  %vm69_vm1 = vcmask 64512  }
  0x38   :  { %274 = vmatprep.subr.mxu0 %v397_v0  ;;  %279 = vmatprep.subr.mxu1 %v397_v0  ;;  %v67_v2 = vld [vmem:[#allocation2] sm:$0xff]  ;;  %v68_v3 = vld [vmem:[#allocation2 + $0x8] sm:$0xff]  ;;  %v65_v4 = vld [vmem:[#allocation5] sm:$0x1]  ;;  %vm60_vm2 = vcmask 253952   ;;  %v233_v8 = vlaneseq  ;;  %s400_s2 = smov [#allocation8]  }
  0x39   :  { %276 = vmatprep.mubr.msk.f32.mxu0 %vm398_vm0, %v397_v0  ;;  %281 = vmatprep.mubr.msk.f32.mxu1 %vm398_vm0, %v397_v0  ;;  %v66_v5 = vld [vmem:[#allocation5 + $0x1] sm:$0x1]  ;;  %v226_v6 = vld [vmem:[#allocation7] sm:$0x1]  ;;  %v227_v7 = vld [vmem:[#allocation7 + $0x1] sm:$0x1] }
  0x3a   :  { %295 = vset.pattern.permute.xlu0 %v399_v1  ;;  %275 = vmatpush3.msra.mxu0 %v67_v2  ;;  %61 = vst.msk [vmem:[#allocation8] sm:$0x1] %vm60_vm2, %v397_v0  ;;  %62 = vst.msk [vmem:[#allocation8 + $0x1] sm:$0x1] %vm60_vm2, %v397_v0  ;;  %v234_v14 = vshrl.u32 %v233_v8, 7  ;;  %s255_s25 = sshll.u32 %s400_s2, 4  ;;  %s256_s25 = int_to_ptr.vmem [resolvable:$true] %s255_s25 }
  0x3b   :  { %280 = vmatpush3.msra.mxu1 %v68_v3  ;;  %277 = vmatmul.mubr.msk.f32.vlgmr.msra.gmra.mrb[0].mxu0 %vm69_vm1, %v65_v4  ;;  %s362_s26 = scalar_lea.vmem %s256_s25, 32  ;;  %p367_p11 = scmp.lt.s32.totalorder %s256_s25, %s256_s25 }
  0x3c   :  { %282 = vmatmul.mubr.msk.f32.vlgmr.msra.gmra.mrb[0].mxu1 %vm69_vm1, %v66_v5  ;;  %230 = vperm.xlu0 %295, %v226_v6   ;;  %v235_v19 = vsub.s32 0, %v234_v14  ;;  %p363_p10 = scmp.ne.s32.totalorder %s256_s25, %s362_s26  ;;  %p368_p12 = scmp.lt.s32.totalorder %s362_s26, %s362_s26 }
  0x3e   :  { %p369_p13 = por %p368_p12, %p367_p11 }
  0x40   :  { %239 = vperm.xlu0 %295, %v227_v7   ;;  %p370_p0 = pnand %p369_p13, %p363_p10 }
  0x41   :  { %v63_v9 = vld [vmem:[#allocation8] sm:$0x1]  ;;  %v64_v10 = vld [vmem:[#allocation8 + $0x1] sm:$0x1] }
  0xbb   :  { %v231_v11 = vpop.permute.xlu0 %230 }
  0xbc   :  { %v236_v21 = vrot.slane %v231_v11, %v235_v19 }
  0xbf   :  { %v240_v20 = vpop.permute.xlu0 %239 }
  0xc0   :  { %v245_v22 = vrot.slane %v240_v20, %v235_v19 }
 0x10e   :  { %v139_v12 = vpop.f32.mrb[0].mxu0 }
 0x10f   :  { %v212_v13 = vpop.f32.mrb[0].mxu1  ;;  %v216_v15 = vadd.f32 %v139_v12, %v63_v9  ;;  %v278_v17 = vpop.f32.mrb[1].mxu0 }
 0x110   :  { %v217_v16 = vadd.f32 %v212_v13, %v64_v10  ;;  %v283_v18 = vpop.f32.mrb[1].mxu1 }
 0x111   :  { %219 = vst.msk [vmem:[#allocation8] sm:$0x1] %vm60_vm2, %v216_v15 }
 0x112   :  { %220 = vst.msk [vmem:[#allocation8 + $0x1] sm:$0x1] %vm60_vm2, %v217_v16 }
 0x118   :  { %v224_v24 = vld [vmem:[#allocation8] sm:$0x1] }
 0x119   :  { %v225_v23 = vld [vmem:[#allocation8 + $0x1] sm:$0x1]  ;;  %v246_v26 = vmul.f32 %v236_v21, %v224_v24 }
 0x11a   :  { %v247_v25 = vmul.f32 %v245_v22, %v225_v23 }
 0x11b   :  { %248 = vst.msk [vmem:[#allocation8] sm:$0x1] %vm60_vm2, %v246_v26 }
 0x11c   :  { %249 = vst.msk [vmem:[#allocation8 + $0x1] sm:$0x1] %vm60_vm2, %v247_v25 }
 0x11d   :  { %373 = shalt.err (!%p370_p0)
}
 0x11e   :  { %s374_s29 = scalar_lea.hbm %s487_s3, 32 }
 0x11f   :  { %p375_p1 = scmp.ne.s32.totalorder %s487_s3, %s374_s29  ;;  %p378_p2 = scmp.lt.u32.totalorder %s374_s29, %s487_s3 }
 0x121   :  { %p380_p3 = pnand %p378_p2, %p375_p1 }
 0x123   :  { %383 = shalt.err (!%p380_p3)
}
 0x124   :  { %261 = dma.vmem_to_hbm [thread:$0]  %s256_s25, 32, %s487_s3, [#allocation4], %s391_s22, %s391_s22, %s392_s23  }
 0x125   :  { %388 = dma.done.wait [#allocation4], 32  }
 0x126   :  { %389 = vsyncadd [#allocation4], 4294967264 }
 0x127   :  { %265 = vsyncpa [#allocation3], 1 }
 0x128   :  { %266 = vsyncpa [#allocation6], 1 }
 0x129   :  { %267 = vsyncpa [#allocation4], 1 }

</bundles_post_ra>
